<compile_context>
chip_gen: v7x
topology: tpu7x:2x2x1
jax: 0.10.0
libtpu: 0.0.40
codegen_flags: <defaults>
</compile_context>

<pallas_src>
import functools

import jax
import jax.numpy as jnp
from jax.experimental import pallas as pl
from jax.experimental.pallas import tpu as pltpu


def _attention_kernel(x_ref, w_ref, ctx_ref, attw_ref):
    """One grid step processes a (TB, S, H) slab of independent batch rows.

    x_ref:    (TB, S, H)  encoder outputs (input dtype)
    w_ref:    (1, 1, H)   attention projection row (f32)
    ctx_ref:  (TB, H)     context vectors (lane-dense)
    attw_ref: (TB, S)     attention weights (lane-dense; wrapper adds unit dim)

    Everything stays on the VPU/XLU (broadcast multiply + lane/sublane reduces)
    in the natural (S=sublane, H=lane) layout of the streamed slab — no MXU,
    no transposes. The kernel is HBM-bound, so compute has ample slack.
    """
    x = x_ref[...]                                    # (TB, S, H)
    w = w_ref[...].astype(jnp.float32)                # (1, 1, H)

    # scores[b, s] = sum_h x[b, s, h] * w[h]   (f32 product, lane reduce over H)
    scores = jnp.sum(x * w, axis=-1)                  # (TB, S) f32

    # softmax over the sequence axis, kept in f32
    m = jnp.max(scores, axis=-1, keepdims=True)
    e = jnp.exp(scores - m)
    denom = jnp.sum(e, axis=-1, keepdims=True)
    weights = e * pl.reciprocal(denom, approx=False)  # (TB, S) f32

    # context[b, h] = sum_s weights[b, s] * x[b, s, h]  (sublane reduce over S)
    ctx = jnp.sum(weights[:, :, None] * x, axis=1)    # (TB, H) f32

    ctx_ref[...] = ctx.astype(ctx_ref.dtype)
    attw_ref[...] = weights.astype(attw_ref.dtype)


def _hw_vmem_capacity_bytes():
    """Physical VMEM per TensorCore; conservative (v7x-sized) fallback."""
    try:
        return int(pltpu.get_tpu_info().vmem_capacity_bytes)
    except Exception:
        return 64 * 1024 * 1024


def _choose_tiling(b, s, h, in_itemsize, out_itemsize):
    """Pick the batch-tile TB and the scoped-VMEM limit from hardware info.

    Targets:
      * large pipelined DMAs (~8 MiB/buffer on 128 MiB-VMEM chips, ~3 MiB on
        64 MiB v7x so both TensorCores get several steps each),
      * enough grid steps for the double-buffered pipeline to overlap,
      * a total footprint (double-buffered I/O blocks + f32 elementwise temps)
        comfortably under the scoped VMEM limit (~25% headroom kept).
    """
    vmem_capacity = _hw_vmem_capacity_bytes()
    big_vmem = vmem_capacity >= 96 * 1024 * 1024           # v5e / v6e
    vmem_limit = min(int(vmem_capacity * 0.75), 96 * 1024 * 1024)

    dma_target = (8 if big_vmem else 3) * 1024 * 1024       # per input buffer
    min_steps = 4 if big_vmem else 8                         # >= 4 steps/TC on v7x

    # Estimated VMEM bytes per in-flight batch row.
    per_row = (2 * s * h * in_itemsize          # x block, double buffered
               + 2 * s * h * 4                  # f32 product temps
               + 2 * (h + s) * out_itemsize)    # output blocks, double buffered
    rows_by_vmem = max(1, (vmem_limit - 2 * 1024 * 1024) // per_row)
    rows_by_dma = max(1, dma_target // max(1, s * h * in_itemsize))
    tb = int(min(rows_by_vmem, rows_by_dma, b))

    # Keep enough grid steps for pipelining / megacore when the batch allows it.
    if b > tb and pl.cdiv(b, tb) < min_steps:
        tb = max(1, pl.cdiv(b, min_steps))

    # Sublane-packing alignment for the (TB, H)/(TB, S) output blocks:
    # 8 rows per packed group at 4 bytes, 16 at 2 bytes, 32 at 1 byte.
    mult = 8 * max(1, 4 // max(1, out_itemsize))
    if tb >= b or b <= mult:
        tb = b                           # block dim == array dim is always legal
    else:
        tb = max(mult, (tb // mult) * mult)

    return tb, vmem_limit


@functools.partial(jax.jit, static_argnames=("block_rows",))
def attention_forward(encoder_outputs, attn_weight, *, block_rows=None):
    """encoder_outputs: (B, S, H); attn_weight: (H, 1) (= nn.Linear(H,1).weight.T).

    Returns (context_vector (B, H), attention_weights (B, S, 1)),
    matching the PyTorch Attention.forward semantics.  bf16 inputs also work:
    scores/softmax/weighted-sum all accumulate in f32 (weights are emitted in
    the input dtype, so bf16 results differ slightly from an f32 reference).
    """
    b, s, h = encoder_outputs.shape
    dtype = encoder_outputs.dtype

    # Lane-dense (1, 1, H) projection row, kept in f32 so score math is f32.
    w3 = attn_weight.reshape(1, 1, h).astype(jnp.float32)

    itemsize = jnp.dtype(dtype).itemsize
    tb, vmem_limit = _choose_tiling(b, s, h, itemsize, itemsize)
    if block_rows is not None:           # test hook: force a multi-step / ragged grid
        tb = min(int(block_rows), b)
    num_blocks = pl.cdiv(b, tb)

    # No wrapper-side padding of the input (that would be an extra full HBM
    # round-trip of the (B,S,H) tensor).  The grid is cdiv(B, TB); any ragged
    # tail block is handled by Pallas boundary handling: tail rows of the last
    # input block hold unspecified VMEM contents, but every batch row is
    # processed independently and out-of-range output rows are never written
    # back, so results are unaffected.
    ctx, attw = pl.pallas_call(
        _attention_kernel,
        out_shape=(
            jax.ShapeDtypeStruct((b, h), dtype),
            jax.ShapeDtypeStruct((b, s), dtype),
        ),
        grid_spec=pltpu.PrefetchScalarGridSpec(
            num_scalar_prefetch=0,
            grid=(num_blocks,),
            in_specs=[
                pl.BlockSpec((tb, s, h), lambda i: (i, 0, 0)),
                pl.BlockSpec((1, 1, h), lambda i: (0, 0, 0)),
            ],
            out_specs=[
                pl.BlockSpec((tb, h), lambda i: (i, 0)),
                pl.BlockSpec((tb, s), lambda i: (i, 0)),
            ],
        ),
        compiler_params=pltpu.CompilerParams(
            dimension_semantics=("parallel",),
            vmem_limit_bytes=int(vmem_limit),
        ),
    )(encoder_outputs, w3)

    context = ctx
    attention_weights = attw.reshape(b, s, 1)    # restore (B, S, 1) like PyTorch
    return context, attention_weights


def _reference(encoder_outputs, attn_weight):
    scores = jnp.einsum("bsh,ho->bso", encoder_outputs, attn_weight)
    weights = jax.nn.softmax(scores, axis=1)
    ctx = jnp.sum(encoder_outputs * weights, axis=1)
    return ctx, weights


if __name__ == "__main__":
    key = jax.random.PRNGKey(0)
    kx, kw, kx2, kw2 = jax.random.split(key, 4)

    # Small (batch, seq, hidden) consistent with the module.
    B, S, H = 2, 8, 32
    encoder_outputs = jax.random.normal(kx, (B, S, H), dtype=jnp.float32)
    # deterministic init mimicking nn.Linear's U(-1/sqrt(H), 1/sqrt(H))
    bound = 1.0 / jnp.sqrt(jnp.float32(H))
    attn_weight = jax.random.uniform(
        kw, (H, 1), dtype=jnp.float32, minval=-bound, maxval=bound)

    ctx, attw = attention_forward(encoder_outputs, attn_weight)
    jax.block_until_ready((ctx, attw))
    ref_ctx, ref_attw = _reference(encoder_outputs, attn_weight)
    assert jnp.allclose(ctx, ref_ctx, atol=1e-5, rtol=1e-5)
    assert jnp.allclose(attw, ref_attw, atol=1e-5, rtol=1e-5)

    # Exercise the multi-step grid with a ragged tail (B % TB != 0, no padding).
    B2, S2, H2 = 20, 8, 128
    x2 = jax.random.normal(kx2, (B2, S2, H2), dtype=jnp.float32)
    bound2 = 1.0 / jnp.sqrt(jnp.float32(H2))
    w2 = jax.random.uniform(
        kw2, (H2, 1), dtype=jnp.float32, minval=-bound2, maxval=bound2)
    ctx2, attw2 = attention_forward(x2, w2, block_rows=8)
    jax.block_until_ready((ctx2, attw2))
    ref_ctx2, ref_attw2 = _reference(x2, w2)
    assert jnp.allclose(ctx2, ref_ctx2, atol=1e-5, rtol=1e-5)
    assert jnp.allclose(attw2, ref_attw2, atol=1e-5, rtol=1e-5)

    print("KERNEL_OK")
</pallas_src>

<mosaic_0001>
module attributes {stable_mosaic.version = 11 : i64} {
  func.func @_attention_kernel(%arg0: i32, %arg1: memref<2x8x32xf32, #tpu.memory_space<vmem>>, %arg2: memref<1x1x32xf32, #tpu.memory_space<vmem>>, %arg3: memref<2x32xf32, #tpu.memory_space<vmem>>, %arg4: memref<2x8xf32, #tpu.memory_space<vmem>>) attributes {dimension_semantics = [#tpu.dimension_semantics<parallel>], iteration_bounds = array<i64: 1>, scalar_prefetch = 0 : i64, scratch_operands = 0 : i64, tpu.core_type = #tpu.core_type<tc>, window_params = [{transform_indices = @transform_0, window_bounds = array<i64: 2, 8, 32>}, {pipeline_mode = #tpu.pipeline_mode<synchronous>, transform_indices = @transform_1, window_bounds = array<i64: 1, 1, 32>}, {transform_indices = @transform_2, window_bounds = array<i64: 2, 32>}, {transform_indices = @transform_3, window_bounds = array<i64: 2, 8>}]} {
    %c0 = arith.constant 0 : index
    %c0_0 = arith.constant 0 : index
    %c0_1 = arith.constant 0 : index
    %0 = vector.load %arg1[%c0, %c0_0, %c0_1] : memref<2x8x32xf32, #tpu.memory_space<vmem>>, vector<2x8x32xf32>
    %c0_2 = arith.constant 0 : index
    %c0_3 = arith.constant 0 : index
    %c0_4 = arith.constant 0 : index
    %1 = vector.load %arg2[%c0_2, %c0_3, %c0_4] : memref<1x1x32xf32, #tpu.memory_space<vmem>>, vector<1x1x32xf32>
    %2 = vector.broadcast %1 : vector<1x1x32xf32> to vector<2x8x32xf32>
    %3 = arith.mulf %0, %2 : vector<2x8x32xf32>
    %cst = arith.constant dense<0.000000e+00> : vector<2x8xf32>
    %4 = vector.multi_reduction <add>, %3, %cst [2] : vector<2x8x32xf32> to vector<2x8xf32>
    %cst_5 = arith.constant dense<0xFF800000> : vector<2xf32>
    %5 = vector.multi_reduction <maximumf>, %4, %cst_5 [1] : vector<2x8xf32> to vector<2xf32>
    %6 = vector.shape_cast %5 : vector<2xf32> to vector<2x1xf32>
    %7 = vector.broadcast %6 : vector<2x1xf32> to vector<2x8xf32>
    %8 = arith.subf %4, %7 : vector<2x8xf32>
    %9 = math.exp %8 : vector<2x8xf32>
    %cst_6 = arith.constant dense<0.000000e+00> : vector<2xf32>
    %10 = vector.multi_reduction <add>, %9, %cst_6 [1] : vector<2x8xf32> to vector<2xf32>
    %11 = vector.shape_cast %10 : vector<2xf32> to vector<2x1xf32>
    %12 = tpu.reciprocal %11 : vector<2x1xf32> -> vector<2x1xf32>
    %13 = vector.broadcast %12 : vector<2x1xf32> to vector<2x8xf32>
    %14 = arith.mulf %9, %13 : vector<2x8xf32>
    %15 = vector.shape_cast %14 : vector<2x8xf32> to vector<2x8x1xf32>
    %16 = vector.broadcast %15 : vector<2x8x1xf32> to vector<2x8x32xf32>
    %17 = arith.mulf %16, %0 : vector<2x8x32xf32>
    %cst_7 = arith.constant dense<0.000000e+00> : vector<2x32xf32>
    %18 = vector.multi_reduction <add>, %17, %cst_7 [1] : vector<2x8x32xf32> to vector<2x32xf32>
    %c0_8 = arith.constant 0 : index
    %c0_9 = arith.constant 0 : index
    %19 = vector.load %arg3[%c0_8, %c0_9] : memref<2x32xf32, #tpu.memory_space<vmem>>, vector<2x32xf32>
    tpu.vector_store %arg3[%c0_8, %c0_9], %18 {strides = array<i32>} : memref<2x32xf32, #tpu.memory_space<vmem>>, vector<2x32xf32>,
    %c0_10 = arith.constant 0 : index
    %c0_11 = arith.constant 0 : index
    %20 = vector.load %arg4[%c0_10, %c0_11] : memref<2x8xf32, #tpu.memory_space<vmem>>, vector<2x8xf32>
    tpu.vector_store %arg4[%c0_10, %c0_11], %14 {strides = array<i32>} : memref<2x8xf32, #tpu.memory_space<vmem>>, vector<2x8xf32>,
    return
  }
  func.func @transform_0(%arg0: i32) -> (i32, i32, i32) {
    %c0_i32 = arith.constant 0 : i32
    %c0_i32_0 = arith.constant 0 : i32
    %c0_i32_1 = arith.constant 0 : i32
    return %arg0, %c0_i32, %c0_i32_0 : i32, i32, i32
  }
  func.func @transform_1(%arg0: i32) -> (i32, i32, i32) {
    %c0_i32 = arith.constant 0 : i32
    %c0_i32_0 = arith.constant 0 : i32
    %c0_i32_1 = arith.constant 0 : i32
    %c0_i32_2 = arith.constant 0 : i32
    return %c0_i32, %c0_i32_0, %c0_i32_1 : i32, i32, i32
  }
  func.func @transform_2(%arg0: i32) -> (i32, i32) {
    %c0_i32 = arith.constant 0 : i32
    %c0_i32_0 = arith.constant 0 : i32
    return %arg0, %c0_i32 : i32, i32
  }
  func.func @transform_3(%arg0: i32) -> (i32, i32) {
    %c0_i32 = arith.constant 0 : i32
    %c0_i32_0 = arith.constant 0 : i32
    return %arg0, %c0_i32 : i32, i32
  }
}

</mosaic_0001>

<bundles_post_ra>
// kernel: attention_forward.1
= control target key start
LH: loop header
LB: loop body
LE: loop exit
PB: predicated region body
PF: predicated region fallthrough
CT: control target
= control target key end

     0   :  { %9 = vsyncpa [#allocation3], 0  ;;  %s353_s0 = inlined_call_operand.hbm [shape: f32[2,8,32], index: 0, kind: input, shape index: {}]   ;;  %s354_s1 = inlined_call_operand.vmem [shape: f32[1,1,32], index: 1, kind: input, shape index: {}]   ;;  %s355_s2 = inlined_call_operand.hbm [shape: f32[2,32], index: 2, kind: output, shape index: {0}]   ;;  %s356_s3 = inlined_call_operand.hbm [shape: f32[2,8], index: 3, kind: output, shape index: {1}]  }
   0x1   :  { %10 = vsyncpa [#allocation4], 0 }
   0x2   :  { %11 = vsyncpa [#allocation7], 0  ;;  %s277_s12 = smov [#allocation2]   ;;  %s205_s16 = scalar_lea.hbm %s353_s0, 256 }
   0x3   :  { %s17_s13 = sshll.u32 %s277_s12, 4  ;;  %p206_p0 = scmp.ne.s32.totalorder %s353_s0, %s205_s16  ;;  %s18_s13 = int_to_ptr.vmem [resolvable:$true] %s17_s13 }
   0x4   :  { %p209_p1 = scmp.lt.u32.totalorder %s205_s16, %s353_s0 }
   0x6   :  { %p211_p2 = pnand %p209_p1, %p206_p0 }
   0x8   :  { %214 = shalt.err (!%p211_p2)
}
   0x9   :  { %s215_s21 = scalar_lea.vmem %s18_s13, 256  ;;  %p220_p4 = scmp.lt.s32.totalorder %s18_s13, %s18_s13 }
   0xa   :  { %p216_p3 = scmp.ne.s32.totalorder %s18_s13, %s215_s21  ;;  %p221_p5 = scmp.lt.s32.totalorder %s215_s21, %s215_s21 }
   0xc   :  { %p222_p6 = por %p221_p5, %p220_p4 }
   0xe   :  { %p223_p7 = pnand %p222_p6, %p216_p3 }
  0x10   :  { %226 = shalt.err (!%p223_p7)
}
  0x11   :  { %s278_s22 = smov 128   ;;  %s279_s23 = smov 8  }
  0x12   :  { %23 = dma.hbm_to_vmem [thread:$0]  %s353_s0, 256, %s18_s13, [#allocation3], %s278_s22, %s278_s22, %s279_s23  }
  0x13   :  { %271 = dma.done.wait [#allocation3], 256  }
  0x14   :  { %272 = vsyncadd [#allocation3], 4294967040  ;;  %v29_v0 = vld [vmem:[#allocation2] sm:$0xff]  ;;  %vm40_vm0 = vcmask 261120   ;;  %v30_v2 = vld [vmem:[#allocation2 + $0x8] sm:$0xff]  ;;  %v49_v7 = vlaneseq  ;;  %vm59_vm1 = vcmask 1041409  }
  0x15   :  { %v190_v1 = vld [vmem:[%s354_s1] ss:$0 sm:$0xff]  ;;  %vm62_vm2 = vcmask 58368   ;;  %v280_v17 = vmov 0   ;;  %s281_s0 = smov [#allocation6]  }
  0x16   :  { %v38_v3 = vmul.f32 %v190_v1, %v29_v0  ;;  %v39_v4 = vmul.f32 %v190_v1, %v30_v2  ;;  %v50_v8 = vand.u32 127, %v49_v7  ;;  %v52_v9 = vshrl.u32 %v49_v7, 7  ;;  %198 = vset.pattern.permute.xlu0 %v280_v17  ;;  %197 = vset.pattern.permute.xlu1 %v280_v17  ;;  %s177_s1 = sshll.u32 %s281_s0, 4  ;;  %s178_s1 = int_to_ptr.vmem [resolvable:$true] %s177_s1 }
  0x17   :  { %s227_s28 = scalar_lea.vmem %s178_s1, 32  ;;  %p232_p9 = scmp.lt.s32.totalorder %s178_s1, %s178_s1 }
  0x18   :  { %v41_v5 = vsel %vm40_vm0, %v38_v3, 0.0  ;;  %v44_v6 = vsel %vm40_vm0, %v39_v4, 0.0  ;;  %v53_v11 = vsub.s32 %v50_v8, %v52_v9  ;;  %v69_v18 = vsub.s32 0, %v52_v9  ;;  %p228_p8 = scmp.ne.s32.totalorder %s178_s1, %s227_s28  ;;  %p233_p10 = scmp.lt.s32.totalorder %s227_s28, %s227_s28 }
  0x19   :  { %42 = vadd.xlane.f32.xlu0 %v41_v5  ;;  %v73_v19 = vsub.s32 1, %v52_v9 }
  0x1a   :  { %p234_p11 = por %p233_p10, %p232_p9 }
  0x1c   :  { %p235_p12 = pnand %p234_p11, %p228_p8 }
  0x1d   :  { %45 = vadd.xlane.f32.xlu0 %v44_v6 }
  0xa6   :  { %v43_v10 = vpop.xlane.xlu0 %42 }
  0xa7   :  { %v54_v13 = vrot.slane %v43_v10, %v53_v11 }
  0xaa   :  { %v46_v12 = vpop.xlane.xlu0 %45 }
  0xab   :  { %v58_v14 = vrot.slane %v46_v12, %v53_v11 }
  0xad   :  { %v60_v15 = vsel %vm59_vm1, %v58_v14, %v54_v13 }
  0xae   :  { %v63_v16 = vsel %vm62_vm2, %v60_v15, -inf }
  0xaf   :  { %64 = vmax.xlane.f32.xlu1 %v63_v16 }
 0x13c   :  { %v65_v20 = vpop.xlane.xlu1 %64 }
 0x13d   :  { %v70_v21 = vrot.slane %v65_v20, %v69_v18  ;;  %v74_v22 = vrot.slane %v65_v20, %v73_v19 }
 0x13f   :  { %v77_v23 = vsub.f32 %v43_v10, %v70_v21  ;;  %v78_v24 = vsub.f32 %v46_v12, %v74_v22 }
 0x141   :  { %v79_v25 = vmul.f32 1.442695, %v77_v23  ;;  %v81_v26 = vmul.f32 1.442695, %v78_v24 }
 0x143   :  { %199 = vpow2.f32 %v79_v25 }
 0x144   :  { %201 = vpow2.f32 %v81_v26 }
 0x14d   :  { %v200_v27 = vpop.eup %199 }
 0x14e   :  { %v202_v28 = vpop.eup %201  ;;  %86 = vperm.xlu1 %197, %v200_v27  }
 0x14f   :  { %89 = vperm.xlu0 %198, %v202_v28  }
 0x1cd   :  { %v87_v29 = vpop.permute.xlu1 %86 }
 0x1ce   :  { %v90_v30 = vpop.permute.xlu0 %89  ;;  %v94_v31 = vrot.slane %v87_v29, %v53_v11 }
 0x1cf   :  { %v98_v32 = vrot.slane %v90_v30, %v53_v11 }
 0x1d1   :  { %v99_v33 = vsel %vm59_vm1, %v98_v32, %v94_v31 }
 0x1d2   :  { %v101_v34 = vsel %vm62_vm2, %v99_v33, 0.0 }
 0x1d3   :  { %102 = vadd.xlane.f32.xlu1 %v101_v34 }
 0x260   :  { %v103_v35 = vpop.xlane.xlu1 %102 }
 0x261   :  { %203 = vrcp.f32 %v103_v35 }
 0x26b   :  { %v204_v36 = vpop.eup %203 }
 0x26c   :  { %v109_v37 = vrot.slane %v204_v36, %v69_v18  ;;  %v113_v39 = vrot.slane %v204_v36, %v73_v19 }
 0x26e   :  { %v116_v38 = vmul.f32 %v200_v27, %v109_v37  ;;  %v117_v40 = vmul.f32 %v202_v28, %v113_v39 }
 0x270   :  { %120 = vperm.xlu0 %198, %v116_v38  }
 0x274   :  { %125 = vperm.xlu0 %198, %v117_v40  }
 0x2ef   :  { %v121_v41 = vpop.permute.xlu0 %120 }
 0x2f0   :  { %v128_v42 = vmul.f32 %v121_v41, %v29_v0  ;;  %v153_v46 = vrot.slane %v121_v41, %v53_v11 }
 0x2f2   :  { %v130_v43 = vsel %vm40_vm0, %v128_v42, 0.0 }
 0x2f3   :  { %v131_v44 = vrot.slane %v130_v43, 4  ;;  %v126_v45 = vpop.permute.xlu0 %125 }
 0x2f4   :  { %v129_v47 = vmul.f32 %v126_v45, %v30_v2  ;;  %v157_v48 = vrot.slane %v126_v45, %v53_v11 }
 0x2f5   :  { %v132_v49 = vadd.f32 %v131_v44, %v130_v43 }
 0x2f6   :  { %v137_v50 = vsel %vm40_vm0, %v129_v47, 0.0  ;;  %v158_v51 = vsel %vm59_vm1, %v157_v48, %v153_v46 }
 0x2f7   :  { %v133_v52 = vrot.slane %v132_v49, 2  ;;  %v138_v53 = vrot.slane %v137_v50, 4  ;;  %160 = vst.msk [vmem:[#allocation6] sm:$0x3] %vm62_vm2, %v158_v51 }
 0x2f8   :  { %238 = shalt.err (!%p235_p12)
}
 0x2f9   :  { %s239_s4 = scalar_lea.hbm %s356_s3, 32 }
 0x2fa   :  { %p240_p13 = scmp.ne.s32.totalorder %s356_s3, %s239_s4  ;;  %p243_p0 = scmp.lt.u32.totalorder %s239_s4, %s356_s3 }
 0x2fc   :  { %p245_p1 = pnand %p243_p0, %p240_p13 }
 0x2fe   :  { %248 = shalt.err (!%p245_p1)
}
 0x2ff   :  { %180 = dma.vmem_to_hbm [thread:$0]  %s178_s1, 32, %s356_s3, [#allocation7]   ;;  %v134_v54 = vadd.f32 %v133_v52, %v132_v49  ;;  %v139_v55 = vadd.f32 %v138_v53, %v137_v50  ;;  %vm148_vm3 = vcmask 254976  }
 0x300   :  { %s282_s11 = smov [#allocation5]  }
 0x301   :  { %v140_v56 = vrot.slane %v139_v55, 2  ;;  %v135_v57 = vrot.slane %v134_v54, 1  ;;  %s167_s12 = sshll.u32 %s282_s11, 4  ;;  %s168_s12 = int_to_ptr.vmem [resolvable:$true] %s167_s12 }
 0x302   :  { %s249_s13 = scalar_lea.vmem %s168_s12, 32  ;;  %p254_p3 = scmp.lt.s32.totalorder %s168_s12, %s168_s12 }
 0x303   :  { %v141_v58 = vadd.f32 %v140_v56, %v139_v55  ;;  %v136_v61 = vadd.f32 %v135_v57, %v134_v54  ;;  %p250_p2 = scmp.ne.s32.totalorder %s168_s12, %s249_s13  ;;  %p255_p4 = scmp.lt.s32.totalorder %s249_s13, %s249_s13 }
 0x305   :  { %v142_v59 = vrot.slane %v141_v58, 1  ;;  %p256_p5 = por %p255_p4, %p254_p3 }
 0x307   :  { %v143_v60 = vadd.f32 %v142_v59, %v141_v58  ;;  %p257_p6 = pnand %p256_p5, %p250_p2 }
 0x309   :  { %v146_v62 = vsel %vm59_vm1, %v143_v60, %v136_v61 }
 0x30a   :  { %149 = vst.msk [vmem:[#allocation5] sm:$0x3] %vm148_vm3, %v146_v62 }
 0x30b   :  { %260 = shalt.err (!%p257_p6)
}
 0x30c   :  { %s261_s15 = scalar_lea.hbm %s355_s2, 32 }
 0x30d   :  { %p262_p7 = scmp.ne.s32.totalorder %s355_s2, %s261_s15  ;;  %p265_p8 = scmp.lt.u32.totalorder %s261_s15, %s355_s2 }
 0x30f   :  { %p267_p9 = pnand %p265_p8, %p262_p7 }
 0x311   :  { %270 = shalt.err (!%p267_p9)
}
 0x312   :  { %170 = dma.vmem_to_hbm [thread:$0]  %s168_s12, 32, %s355_s2, [#allocation4]  }
 0x313   :  { %273 = dma.done.wait [#allocation4], 32  }
 0x314   :  { %274 = vsyncadd [#allocation4], 4294967264 }
 0x315   :  { %275 = dma.done.wait [#allocation7], 32  }
 0x316   :  { %276 = vsyncadd [#allocation7], 4294967264 }
 0x317   :  { %187 = vsyncpa [#allocation3], 1 }
 0x318   :  { %188 = vsyncpa [#allocation4], 1 }
 0x319   :  { %189 = vsyncpa [#allocation7], 1 }

</bundles_post_ra>
